<compile_context>
chip_gen: v6e
topology: v6e:2x2x1
jax: 0.10.0
libtpu: 0.0.40
codegen_flags: <defaults>
</compile_context>

<pallas_src>
import jax
import jax.numpy as jnp
from jax import lax
from jax.experimental import pallas as pl
from jax.experimental.pallas import tpu as pltpu
import numpy as np

BN_EPS = 1e-5


# ---------------------------------------------------------------------------
# Pass 1: conv (transposed matmul) + per-tile BN partial statistics
# ---------------------------------------------------------------------------
def conv_stats_kernel(wT_ref, xT_ref, y_ref, stats_ref):
    # (C_out, K) @ (K, tile_M) -> (C_out, tile_M); bf16 operands, f32 accumulation.
    y = jnp.dot(wT_ref[...], xT_ref[...], preferred_element_type=jnp.float32)
    y_ref[...] = y                                             # lane-dense store
    # Per-channel partial statistics for this tile (lane reduction -> XLU), f32.
    s = jnp.sum(y, axis=1, keepdims=True)                      # (C_out, 1)
    ss = jnp.sum(y * y, axis=1, keepdims=True)                 # (C_out, 1)
    stats_ref[...] = jnp.concatenate([s, ss], axis=1)[None]    # (1, C_out, 2)


# ---------------------------------------------------------------------------
# Pass 2: folded BatchNorm (single FMA per element) + PReLU
# ---------------------------------------------------------------------------
def bn_prelu_kernel(scale_ref, shift_ref, alpha_ref, y_ref, o_ref):
    z = y_ref[...] * scale_ref[...] + shift_ref[...]           # (C_out, tile_M), f32
    o_ref[...] = jnp.where(z >= 0.0, z, alpha_ref[...] * z)    # PReLU (shared alpha)


# ---------------------------------------------------------------------------
# Host-side helpers
# ---------------------------------------------------------------------------
def _round_up(x, m):
    return (x + m - 1) // m * m


def _pick_tile_m(m):
    # Biggest of a few lane-multiple candidates that does not grossly over-pad
    # tiny problems. 512 rows is the sweet spot for realistic sizes.
    for t in (512, 256, 128):
        if m >= t:
            return t
    return 128


def _im2col_T(x, kh, kw, sh, sw, pad):
    """NCHW -> transposed patch matrix (K, M).
    K ordered (c_in, kh, kw) to match PyTorch's (C_out, C_in, kh, kw) weight
    flattening; M ordered (n, h_out, w_out)."""
    n, cin, h, w = x.shape
    if pad:
        x = jnp.pad(x, ((0, 0), (0, 0), (pad, pad), (pad, pad)))
    hp, wp = h + 2 * pad, w + 2 * pad
    ho = (hp - kh) // sh + 1
    wo = (wp - kw) // sw + 1
    ii = (jnp.arange(ho) * sh)[:, None, None, None] + jnp.arange(kh)[None, None, :, None]
    jj = (jnp.arange(wo) * sw)[None, :, None, None] + jnp.arange(kw)[None, None, None, :]
    patches = x[:, :, ii, jj]                                  # (N, C_in, Ho, Wo, kh, kw)
    patches = jnp.transpose(patches, (1, 4, 5, 0, 2, 3))       # (C_in, kh, kw, N, Ho, Wo)
    return patches.reshape(cin * kh * kw, n * ho * wo), (n, ho, wo)


def conv2d_block_forward(x, w, gamma, beta, alpha, stride=(2, 1), pad=0):
    """Forward of Conv2dBlock(in_c, out_c, k, stride=(2,1), pad=0, norm_fn='bn',
    act='prelu').  Conv has no bias (norm_fn='bn'); BN uses train-mode batch stats."""
    cout, cin, kh, kw = w.shape
    sh, sw = stride

    xT, (n, ho, wo) = _im2col_T(x, kh, kw, sh, sw, pad)        # (K, M), f32
    k_dim, m = xT.shape

    tile_m = _pick_tile_m(m)
    m_pad = _round_up(m, tile_m)
    n_tiles = m_pad // tile_m
    if m_pad != m:
        xT = jnp.pad(xT, ((0, 0), (0, m_pad - m)))             # zero cols -> y == 0

    xT = xT.astype(jnp.bfloat16)                               # bf16 MXU operands
    wT = w.reshape(cout, k_dim).astype(jnp.bfloat16)           # (C_out, K)

    cparams = pltpu.CompilerParams(
        dimension_semantics=("parallel",),                     # independent M-tiles
        vmem_limit_bytes=32 * 1024 * 1024,                     # explicit; ample headroom
    )

    # -------- pass 1: conv matmul + per-tile partial stats --------------------
    y, stats = pl.pallas_call(
        conv_stats_kernel,
        grid=(n_tiles,),
        in_specs=[
            pl.BlockSpec((cout, k_dim), lambda i: (0, 0)),     # weights (stay resident)
            pl.BlockSpec((k_dim, tile_m), lambda i: (0, i)),   # im2col^T tile
        ],
        out_specs=(
            pl.BlockSpec((cout, tile_m), lambda i: (0, i)),    # conv output tile (lane-dense)
            pl.BlockSpec((1, cout, 2), lambda i: (i, 0, 0)),   # per-tile (sum, sumsq)
        ),
        out_shape=(
            jax.ShapeDtypeStruct((cout, m_pad), jnp.float32),
            jax.ShapeDtypeStruct((n_tiles, cout, 2), jnp.float32),
        ),
        compiler_params=cparams,
    )(wT, xT)

    # -------- tiny cross-tile combine + BN fold (plain JAX, (C_out,)-sized) ---
    gamma_f = gamma.astype(jnp.float32)
    beta_f = beta.astype(jnp.float32)
    totals = jnp.sum(stats, axis=0)                            # (C_out, 2)
    mean = totals[:, 0] / m                                    # true M (padding is zeros)
    var = jnp.maximum(totals[:, 1] / m - mean * mean, 0.0)     # biased var (PyTorch fwd)
    inv_std = lax.rsqrt(var + BN_EPS)
    scale = (gamma_f * inv_std).reshape(cout, 1)
    shift = (beta_f - mean * gamma_f * inv_std).reshape(cout, 1)
    alpha2d = jnp.asarray(alpha, jnp.float32).reshape(1, 1)

    # -------- pass 2: y*scale + shift, then PReLU ------------------------------
    out = pl.pallas_call(
        bn_prelu_kernel,
        grid=(n_tiles,),
        in_specs=[
            pl.BlockSpec((cout, 1), lambda i: (0, 0)),         # scale (resident)
            pl.BlockSpec((cout, 1), lambda i: (0, 0)),         # shift (resident)
            pl.BlockSpec((1, 1), lambda i: (0, 0)),            # PReLU alpha
            pl.BlockSpec((cout, tile_m), lambda i: (0, i)),    # conv output tile
        ],
        out_specs=pl.BlockSpec((cout, tile_m), lambda i: (0, i)),
        out_shape=jax.ShapeDtypeStruct((cout, m_pad), jnp.float32),
        compiler_params=cparams,
    )(scale, shift, alpha2d, y)

    # (C_out, M) -> (C_out, N, Ho, Wo) -> NCHW (leading-dim swap only; minor dims untouched).
    out = out[:, :m].reshape(cout, n, ho, wo)
    return jnp.transpose(out, (1, 0, 2, 3))


def _reference(x, w, gamma, beta, alpha, stride=(2, 1), pad=0):
    """Plain-JAX f32 reference mirroring the PyTorch module (train-mode BN)."""
    y = lax.conv_general_dilated(
        x, w, window_strides=stride, padding=[(pad, pad), (pad, pad)],
        dimension_numbers=("NCHW", "OIHW", "NCHW"))
    mean = jnp.mean(y, axis=(0, 2, 3), keepdims=True)
    var = jnp.mean((y - mean) ** 2, axis=(0, 2, 3), keepdims=True)
    y_bn = (y - mean) * lax.rsqrt(var + BN_EPS)
    y_bn = y_bn * gamma.reshape(1, -1, 1, 1) + beta.reshape(1, -1, 1, 1)
    return jnp.where(y_bn >= 0.0, y_bn, alpha * y_bn)


if __name__ == "__main__":
    # Conv2dBlock(in_channels=4, out_channels=8, kernel_size=(3,3), stride=(2,1),
    #             pad=0, norm_fn='bn', act='prelu')
    in_channels, out_channels = 4, 8
    kh, kw = 3, 3

    key = jax.random.PRNGKey(0)
    kx, kw_, kg, kb = jax.random.split(key, 4)

    x = jax.random.normal(kx, (2, in_channels, 16, 16), dtype=jnp.float32)
    w = 0.1 * jax.random.normal(kw_, (out_channels, in_channels, kh, kw), dtype=jnp.float32)
    gamma = 1.0 + 0.1 * jax.random.normal(kg, (out_channels,), dtype=jnp.float32)
    beta = 0.1 * jax.random.normal(kb, (out_channels,), dtype=jnp.float32)
    alpha = jnp.asarray(0.25, dtype=jnp.float32)  # nn.PReLU() default init

    out = conv2d_block_forward(x, w, gamma, beta, alpha)
    out = jax.block_until_ready(out)

    ref = jax.block_until_ready(_reference(x, w, gamma, beta, alpha))
    assert out.shape == ref.shape == (2, out_channels, 7, 14), out.shape
    # bf16 matmul operands -> ~1e-2-level relative differences vs. the f32 reference.
    np.testing.assert_allclose(np.asarray(out), np.asarray(ref), rtol=2e-2, atol=2e-2)

    print("KERNEL_OK")
</pallas_src>

<mosaic_0001>
module attributes {stable_mosaic.version = 11 : i64} {
  func.func @conv_stats_kernel(%arg0: i32, %arg1: memref<8x36xbf16, #tpu.memory_space<vmem>>, %arg2: memref<36x128xbf16, #tpu.memory_space<vmem>>, %arg3: memref<8x128xf32, #tpu.memory_space<vmem>>, %arg4: memref<1x8x2xf32, #tpu.memory_space<vmem>>) attributes {dimension_semantics = [#tpu.dimension_semantics<parallel>], iteration_bounds = array<i64: 2>, scalar_prefetch = 0 : i64, scratch_operands = 0 : i64, tpu.core_type = #tpu.core_type<tc>, window_params = [{pipeline_mode = #tpu.pipeline_mode<synchronous>, transform_indices = @transform_0, window_bounds = array<i64: 8, 36>}, {transform_indices = @transform_1, window_bounds = array<i64: 36, 128>}, {transform_indices = @transform_2, window_bounds = array<i64: 8, 128>}, {transform_indices = @transform_3, window_bounds = array<i64: 1, 8, 2>}]} {
    %c0 = arith.constant 0 : index
    %c0_0 = arith.constant 0 : index
    %0 = vector.load %arg1[%c0, %c0_0] : memref<8x36xbf16, #tpu.memory_space<vmem>>, vector<8x36xbf16>
    %c0_1 = arith.constant 0 : index
    %c0_2 = arith.constant 0 : index
    %1 = vector.load %arg2[%c0_1, %c0_2] : memref<36x128xbf16, #tpu.memory_space<vmem>>, vector<36x128xbf16>
    %cst = arith.constant dense<0.000000e+00> : vector<8x128xf32>
    %2 = tpu.matmul %0, %1, %cst {dimension_numbers = #tpu.dot_dimension_numbers<[1], [0], [0], [1], [0, 0, 1, 1], [], []>} : vector<8x36xbf16>, vector<36x128xbf16>, vector<8x128xf32> -> vector<8x128xf32>
    %c0_3 = arith.constant 0 : index
    %c0_4 = arith.constant 0 : index
    %3 = vector.load %arg3[%c0_3, %c0_4] : memref<8x128xf32, #tpu.memory_space<vmem>>, vector<8x128xf32>
    tpu.vector_store %arg3[%c0_3, %c0_4], %2 {strides = array<i32>} : memref<8x128xf32, #tpu.memory_space<vmem>>, vector<8x128xf32>,
    %cst_5 = arith.constant dense<0.000000e+00> : vector<8xf32>
    %4 = vector.multi_reduction <add>, %2, %cst_5 [1] : vector<8x128xf32> to vector<8xf32>
    %5 = vector.shape_cast %4 : vector<8xf32> to vector<8x1xf32>
    %6 = arith.mulf %2, %2 : vector<8x128xf32>
    %cst_6 = arith.constant dense<0.000000e+00> : vector<8xf32>
    %7 = vector.multi_reduction <add>, %6, %cst_6 [1] : vector<8x128xf32> to vector<8xf32>
    %8 = vector.shape_cast %7 : vector<8xf32> to vector<8x1xf32>
    %9 = tpu.concatenate %5, %8 in 1 : vector<8x1xf32>, vector<8x1xf32> -> vector<8x2xf32>
    %10 = vector.shape_cast %9 : vector<8x2xf32> to vector<1x8x2xf32>
    %c0_7 = arith.constant 0 : index
    %c0_8 = arith.constant 0 : index
    %c0_9 = arith.constant 0 : index
    %11 = vector.load %arg4[%c0_7, %c0_8, %c0_9] : memref<1x8x2xf32, #tpu.memory_space<vmem>>, vector<1x8x2xf32>
    tpu.vector_store %arg4[%c0_7, %c0_8, %c0_9], %10 {strides = array<i32>} : memref<1x8x2xf32, #tpu.memory_space<vmem>>, vector<1x8x2xf32>,
    return
  }
  func.func @transform_0(%arg0: i32) -> (i32, i32) {
    %c0_i32 = arith.constant 0 : i32
    %c0_i32_0 = arith.constant 0 : i32
    %c0_i32_1 = arith.constant 0 : i32
    return %c0_i32, %c0_i32_0 : i32, i32
  }
  func.func @transform_1(%arg0: i32) -> (i32, i32) {
    %c0_i32 = arith.constant 0 : i32
    %c0_i32_0 = arith.constant 0 : i32
    return %c0_i32, %arg0 : i32, i32
  }
  func.func @transform_2(%arg0: i32) -> (i32, i32) {
    %c0_i32 = arith.constant 0 : i32
    %c0_i32_0 = arith.constant 0 : i32
    return %c0_i32, %arg0 : i32, i32
  }
  func.func @transform_3(%arg0: i32) -> (i32, i32, i32) {
    %c0_i32 = arith.constant 0 : i32
    %c0_i32_0 = arith.constant 0 : i32
    %c0_i32_1 = arith.constant 0 : i32
    return %arg0, %c0_i32, %c0_i32_0 : i32, i32, i32
  }
}

</mosaic_0001>

<bundles_post_ra>
// kernel: tpu_custom_call.1
= control target key start
LH: loop header
LB: loop body
LE: loop exit
PB: predicated region body
PF: predicated region fallthrough
CT: control target
= control target key end

     0   :  { %9 = vsyncpa [#allocation3], 0  ;;  %s842_s0 = inlined_call_operand.hbm [shape: bf16[8,36], index: 0, kind: input, shape index: {}]   ;;  %s843_s1 = inlined_call_operand.hbm [shape: bf16[36,256], index: 1, kind: input, shape index: {}]   ;;  %s844_s2 = inlined_call_operand.hbm [shape: f32[8,256], index: 2, kind: output, shape index: {0}]   ;;  %s845_s3 = inlined_call_operand.vmem [shape: f32[2,8,2], index: 3, kind: output, shape index: {1}]  }
   0x1   :  { %10 = vsyncpa [#allocation6], 0 }
   0x2   :  { %12 = vsyncpa [#allocation6 + $0x1], 0 }
   0x3   :  { %13 = vsyncpa [#allocation4], 0 }
   0x4   :  { %15 = vsyncpa [#allocation4 + $0x1], 0  ;;  %s669_s12 = smov 0   ;;  %s671_s13 = smov 0  }
   0x5   :  { %s673_s14 = smov 0   ;;  %s675_s15 = smov 0  }
   0x6 LB: > { %s690_s16 = sadd.s32 4294967295, %s639_s15   ;;  %s419_s17 = sadd.s32 4294967294, %s639_s15   ;;  %s639_s15 = sphi %s675_s15, %s868_s15   ;;  %s635_s14 = sphi %s673_s14, %s867_s14   ;;  %s631_s13 = sphi %s671_s13, %s866_s13   ;;  %s627_s12 = sphi %s669_s12, %s865_s12  }
   0x7   : > { %s694_s18 = sadd.s32 1, %s639_s15   ;;  %s49_s19 = sadd.s32 1, %s635_s14 }
   0x8   : > { %s46_s20 = ssub.s32 %s639_s15, %s694_s18  ;;  %p56_p0 = scmp.ne.s32.totalorder %s635_s14, %s631_s13 }
   0x9   : > { %p47_p1 = scmp.eq.s32.totalorder %s46_s20, 0  ;;  %p57_p2 = scmp.eq.s32.totalorder %s639_s15, 0 }
   0xa   : > { %p62_p3 = scmp.ne.s32.totalorder %s631_s13, %s627_s12  ;;  %p846_p4 = scmp.eq.s32.totalorder %s690_s16, 0 }
   0xb   : > { %s706_s21 = scalar_select %p47_p1, %s635_s14, %s49_s19  }
   0xc   : > { %p708_p5 = por %p57_p2, %p56_p0  ;;  %p714_p6 = por %p846_p4, %p62_p3 }
   0xd   : > { %p86_p7 = scmp.eq.s32.totalorder %s690_s16, 1  ;;  %p92_p8 = scmp.eq.s32.totalorder %s419_s17, 1 }
   0xe   : > { %s851_s23 = scalar_select %p714_p6, 1, 0 }
   0xf   : > { %p420_p9 = scmp.ge.s32.totalorder %s639_s15, 1  ;;  %p125_p10 = scmp.lt.s32.totalorder %s639_s15, 3 }
  0x10   : > { %p721_p11 = por %p86_p7, %p56_p0  ;;  %p725_p12 = por %p92_p8, %p62_p3 }
  0x11   : > { %p729_p13 = pnand %p420_p9, %p125_p10  ;;  %s641_s27 = smov [#allocation2]  }
  0x12   : > { %s852_s24 = scalar_select %p721_p11, 1, 0 }
  0x13   : > { %s853_s25 = scalar_select %p725_p12, 1, 0 }
  0x14   : > { %s854_s26 = scalar_select %p729_p13, 1, 0 }
  0x15   : > { %p460_p2 = pneg %p729_p13  ;;  %s138_s28 = sshll.u32 %s641_s27, 4  ;;  %s139_s28 = int_to_ptr.vmem [resolvable:$true] %s138_s28 }
  0x16   : > { %p473_p4 = scmp.lt.s32.totalorder %s639_s15, 2  ;;  %p855_p0 = scmp.eq.s32.totalorder %s690_s16, 0 }
  0x17   : > { %s149_s30 = sand.u32 1, %s635_s14   ;;  %s528_s6 = scalar_lea.vmem %s139_s28, 64 }
  0x18   : > { %p739_p7 = pnand %p460_p2, %p855_p0  ;;  %p746_p3 = pnand %p473_p4, %p708_p5 }
  0x19   : > { %s450_s5 = smul.u32 20, %s149_s30  ;;  %p529_p9 = scmp.ne.s32.totalorder %s139_s28, %s528_s6 }
  0x1a   : > { %p519_p8 = pneg %p739_p7  ;;  %p536_p12 = scmp.lt.s32.totalorder %s139_s28, %s139_s28 }
  0x1b   : > { %p537_p11 = scmp.lt.s32.totalorder %s528_s6, %s528_s6 }
  0x1c   : > { %p531_p10 = pnand %p529_p9, %p519_p8 }
  0x1d   : > { %p538_p2 = por %p537_p11, %p536_p12 }
  0x1e   : > { %p532_p1 = pneg %p531_p10 }
  0x20   : > { %p539_p0 = pnand %p538_p2, %p532_p1 }
  0x22   : > { %542 = shalt.err (!%p539_p0)
}
  0x23   : > { %463 = dma.hbm_to_vmem [thread:$0]  (!%p739_p7), %s842_s0, 64, %s139_s28, [#allocation3]  }
  0x24   : > { %s423_s9 = sshll.u32 %s639_s15, 6  ;;  %s153_s10 = scalar_lea.vmem [#allocation5], %s450_s5 }
  0x25   : > { %s159_s11 = sshll.u32 %s153_s10, 4  ;;  %s761_s20 = scalar_lea.hbm %s843_s1, %s423_s9  ;;  %s763_s11 = int_to_ptr.vmem [resolvable:$true] %s159_s11 }
  0x26   : > { %s765_s22 = scalar_lea.sflag [#allocation6], %s149_s30  ;;  %s543_s27 = scalar_lea.hbm %s761_s20, 320 }
  0x27   : > { %p544_p4 = scmp.ne.s32.totalorder %s761_s20, %s543_s27  ;;  %p545_p5 = pneg %p746_p3 }
  0x28   : > { %s548_s5 = scalar_lea.hbm %s843_s1, 640  ;;  %p549_p1 = scmp.lt.s32.totalorder %s761_s20, %s843_s1 }
  0x29   : > { %p546_p11 = pnand %p545_p5, %p544_p4  ;;  %p550_p7 = scmp.lt.s32.totalorder %s548_s5, %s543_s27 }
  0x2b   : > { %p547_p12 = pneg %p546_p11  ;;  %p551_p8 = por %p550_p7, %p549_p1 }
  0x2d   : > { %p552_p9 = pnand %p551_p8, %p547_p12 }
  0x2f   : > { %555 = shalt.err (!%p552_p9)
}
  0x30   : > { %s556_s30 = scalar_lea.vmem %s763_s11, 320  ;;  %s642_s8 = smov [#allocation5]  }
  0x31   : > { %p557_p10 = scmp.ne.s32.totalorder %s763_s11, %s556_s30  ;;  %s561_s9 = sshll.u32 %s642_s8, 4  ;;  %s562_s9 = int_to_ptr.vmem [resolvable:$false] %s561_s9 }
  0x32   : > { %s563_s10 = scalar_lea.vmem %s562_s9, 640  ;;  %p564_p4 = scmp.lt.s32.totalorder %s763_s11, %s562_s9 }
  0x33   : > { %p559_p2 = pnand %p557_p10, %p545_p5  ;;  %p565_p11 = scmp.lt.s32.totalorder %s563_s10, %s556_s30 }
  0x35   : > { %p560_p0 = pneg %p559_p2  ;;  %p566_p6 = por %p565_p11, %p564_p4 }
  0x37   : > { %p567_p13 = pnand %p566_p6, %p560_p0 }
  0x39   : > { %570 = shalt.err (!%p567_p13)
}
  0x3a   : > { %s643_s17 = smov 128   ;;  %s644_s19 = smov 64  }
  0x3b   : > { %s645_s27 = smov 4   ;;  %p858_p5 = scmp.ne.s32.totalorder %s854_s26, 0 }
  0x3c   : > { %467 = dma.hbm_to_vmem [thread:$0]  (!%p746_p3), %s761_s20, 320, %s763_s11, %s765_s22, %s643_s17, %s644_s19, %s645_s27  }
  0x3d   : > { %171 = sbr.rel (%p858_p5) target bundleno = 423 (0x1a7), region = 28  ;;  %p859_p12 = scmp.eq.s32.totalorder (!%p858_p5), %s690_s16, 0 }
  0x42   : > { %614 = dma.done.wait (%p859_p12), [#allocation3], 64   ;;  %p860_p1 = pmov %p859_p12 }
  0x43   : > { %s793_s28 = sand.u32 1, %s631_s13   ;;  %p861_p6 = scmp.ne.s32.totalorder %s851_s23, 0 }
  0x44   : > { %616 = vsyncadd (%p860_p1), [#allocation3], 4294967232  ;;  %s451_s29 = smul.u32 20, %s793_s28  ;;  %s178_s5 = scalar_lea.sflag [#allocation6], %s793_s28 }
  0x46   : > { %s181_s6 = scalar_lea.vmem [#allocation5], %s451_s29 }
  0x47   : > { %618 = dma.done.wait (%p861_p6), %s178_s5, 320  }
  0x48   : > { %620 = vsyncadd (%p861_p6), %s178_s5, 4294966976  ;;  %v646_v0 = vmov 0.0   ;;  %vm647_vm0 = vmmov 0   ;;  %vm238_vm1 = vcmask 1041408   ;;  %v515_v3 = vld [vmem:[%s181_s6 + $0x8] sm:$0xff]   ;;  %v516_v4 = vld [vmem:[%s181_s6] sm:$0xff]  }
  0x49   : > { %440 = vmatprep.subr.bf16.mxu0 %v646_v0  ;;  %446 = vmatprep.mubr.msk.bf16.mxu0 %vm647_vm0, %v646_v0  ;;  %v514_v1 = vld [vmem:[%s181_s6 + $0x10] ss:$0 sps:$4 sm:$0x33]   ;;  %v213_v5 = vld [vmem:[#allocation2] sm:$0xf]  ;;  %vm234_vm2 = vcmask 293888  }
  0x4a   : > { %v240_v2 = vsel %vm238_vm1, %v514_v1, 0  ;;  %s426_s23 = sshll.u32 %s793_s28, 3  ;;  %s433_s4 = sshll.u32 %s690_s16, 7 }
  0x4b   : > { %441 = vmatpush3.bf16.msra.mxu0 %v240_v2  ;;  %s201_s26 = scalar_lea.vmem [#allocation7], %s426_s23  ;;  %s308_s22 = scalar_lea.hbm %s844_s2, %s433_s4 }
  0x4c   : > { %442 = vmatprep.subr.bf16.mxu0 %v646_v0  ;;  %s310_s7 = sshll.u32 %s201_s26, 4  ;;  %s293_s30 = scalar_lea.sflag [#allocation4], %s793_s28  ;;  %s311_s7 = int_to_ptr.vmem [resolvable:$true] %s310_s7 }
  0x4d   : > { %s571_s8 = scalar_lea.vmem %s311_s7, 128  ;;  %p862_p3 = scmp.ne.s32.totalorder %s852_s24, 0 }
  0x4e   : > { %p572_p13 = scmp.ne.s32.totalorder %s311_s7, %s571_s8  ;;  %s648_s9 = smov [#allocation7]  }
  0x4f   : > { %443 = vmatpush3.bf16.msra.mxu0 %v515_v3  ;;  %s575_s10 = sshll.u32 %s648_s9, 4  ;;  %s576_s10 = int_to_ptr.vmem [resolvable:$false] %s575_s10 }
  0x50   : > { %444 = vmatprep.subr.bf16.mxu0 %v646_v0  ;;  %p573_p7 = pnand %p572_p13, %p862_p3  ;;  %s577_s17 = scalar_lea.vmem %s576_s10, 256 }
  0x51   : > { %p578_p9 = scmp.lt.s32.totalorder %s311_s7, %s576_s10  ;;  %p579_p10 = scmp.lt.s32.totalorder %s577_s17, %s571_s8 }
  0x52   : > { %p574_p8 = pneg %p573_p7 }
  0x53   : > { %445 = vmatpush3.bf16.msra.mxu0 %v516_v4  ;;  %p580_p2 = por %p579_p10, %p578_p9 }
  0x55   : > { %p581_p0 = pnand %p580_p2, %p574_p8 }
  0x56   : > { %447 = vmatmul.mubr.msk.bf16.vlgmr.msra.gmra.mxu0 %vm234_vm2, %v213_v5 }
 0x116   : > { %v276_v6 = vpop.f32.mrf.mxu0 }
 0x117   : > { %282 = vst [vmem:[%s201_s26] sm:$0xff] %v276_v6  ;;  %283 = vadd.xlane.f32.xlu0 %v276_v6  ;;  %v285_v8 = vmul.f32 %v276_v6, %v276_v6 }
 0x118   : > { %v448_v7 = vpop.f32.mrf.mxu0 }
 0x11a   : > { %v279_v9 = vpop.f32.mrf.mxu0 }
 0x11b   : > { %286 = vadd.xlane.f32.xlu0 %v285_v8 }
 0x11c   : > { %v449_v10 = vpop.f32.mrf.mxu0 }
 0x11d   : > { %584 = shalt.err (!%p581_p0)
}
 0x11e   : > { %s585_s19 = scalar_lea.hbm %s308_s22, 128  ;;  %s589_s29 = scalar_lea.hbm %s844_s2, 256 }
 0x11f   : > { %p586_p4 = scmp.ne.s32.totalorder %s308_s22, %s585_s19  ;;  %p590_p12 = scmp.lt.s32.totalorder %s308_s22, %s844_s2 }
 0x120   : > { %p591_p1 = scmp.lt.s32.totalorder %s589_s29, %s585_s19 }
 0x121   : > { %p587_p11 = pnand %p586_p4, %p862_p3 }
 0x122   : > { %p592_p6 = por %p591_p1, %p590_p12 }
 0x123   : > { %p588_p5 = pneg %p587_p11 }
 0x125   : > { %p593_p13 = pnand %p592_p6, %p588_p5 }
 0x127   : > { %596 = shalt.err (!%p593_p13)
}
 0x128   : > { %458 = dma.vmem_to_hbm [thread:$0]  (%p862_p3), %s311_s7, 128, %s308_s22, %s293_s30   ;;  %vm288_vm3 = vcmask 7168   ;;  %vm290_vm4 = vcmask 15360  }
 0x129   : > { %p208_p7 = scmp.lt.s32.totalorder %s690_s16, 1 }
 0x12b   : > { %s870_s16 = smov (!%p208_p7, %s690_s16), 1 }
 0x12c   : > { %s427_s23 = sshll.u32 %s870_s16, 3 }
 0x12d   : > { %s211_s11 = scalar_lea.vmem %s845_s3, %s427_s23 }
 0x1a0   : > { %v284_v11 = vpop.xlane.xlu0 %283 }
 0x1a4   : > { %v287_v12 = vpop.xlane.xlu0 %286 }
 0x1a5   : > { %v289_v13 = vsel %vm288_vm3, %v284_v11, %v287_v12 }
 0x1a6   : > { %291 = vst.msk [vmem:[%s211_s11] sm:$0xff] %vm290_vm4, %v289_v13 }
 0x1a7 PF: > { %s325_s24 = sand.u32 1, %s627_s12   ;;  %p863_p8 = scmp.ne.s32.totalorder %s853_s25, 0 }
 0x1a8   : > { %p864_p3 = scmp.ge.s32.totalorder %s639_s15, 2  ;;  %s326_s20 = scalar_lea.sflag [#allocation4], %s325_s24 }
 0x1aa   : > { %p469_p9 = pnand %p864_p3, %p863_p8 }
 0x1ac   : > { %p470_p10 = pneg %p469_p9 }
 0x1ae   : > { %622 = dma.done.wait (%p470_p10), %s326_s20, 128  }
 0x1af   : > { %624 = vsyncadd (%p470_p10), %s326_s20, 4294967168  ;;  %p18_p2 = scmp.ge.s32.totalorder %s694_s18, 4   ;;  %s865_s12 = smov %s631_s13 }
 0x1b0   : > { %s866_s13 = smov %s635_s14  ;;  %s867_s14 = smov %s706_s21 }
 0x1b1   : > { %s868_s15 = smov %s694_s18  ;;  %20 = sbr.rel (!%p18_p2) target bundleno = 6 (0x6), region = 90 }
 0x1b6   :  { %338 = vsyncpa [#allocation3], 1 }
 0x1b7   :  { %340 = vsyncpa [#allocation3 + $0x1], 1 }
 0x1b8   :  { %341 = vsyncpa [#allocation6], 1 }
 0x1b9   :  { %343 = vsyncpa [#allocation6 + $0x1], 1 }
 0x1ba   :  { %344 = vsyncpa [#allocation4], 1 }
 0x1bb   :  { %346 = vsyncpa [#allocation4 + $0x1], 1 }

</bundles_post_ra>
